<compile_context>
chip_gen: v6e
topology: v6e:2x2x1
jax: 0.10.0
libtpu: 0.0.40
codegen_flags: <defaults>
</compile_context>

<pallas_src>
import functools

import jax
import jax.numpy as jnp
from jax import lax
from jax.experimental import pallas as pl
from jax.experimental.pallas import tpu as pltpu


_NEG_INF = -1000000000.0   # same bias magnitude the PyTorch module uses


# -----------------------------------------------------------------------------
# Kernels
# -----------------------------------------------------------------------------

def _sdpa_full_kernel(*refs, inv_temperature, has_mask):
    """One (batch, head-block, q-tile) step with the full key axis resident.

    Writes both the output tile and the attention-probability tile.
    """
    if has_mask:
        q_ref, k_ref, v_ref, mask_ref, o_ref, attn_ref = refs
    else:
        q_ref, k_ref, v_ref, o_ref, attn_ref = refs
        mask_ref = None

    q = q_ref[0] * inv_temperature     # (HB, TQ, D), caller dtype (torch does q/T first)
    k = k_ref[0]                       # (HB, Lk, D)
    v = v_ref[0]                       # (HB, Lk, D)

    # scores = (q/T) @ k^T: contract D (no materialized transpose), batched over heads,
    # MXU consumes the input precision, accumulates in f32.
    s = lax.dot_general(q, k, (((2,), (2,)), ((0,), (0,))),
                        preferred_element_type=jnp.float32)            # (HB, TQ, Lk)

    if has_mask:
        # One select instead of scores + (1-m)*-1e9 (3 VPU ops + cast -> 1 vselect).
        s = jnp.where(mask_ref[0] != 0, s, _NEG_INF)

    # Numerically stable softmax over Lk in f32; single live (HB, TQ, Lk) temporary.
    s = jnp.exp(s - jnp.max(s, axis=-1, keepdims=True))
    p = s * (1.0 / jnp.sum(s, axis=-1, keepdims=True))   # exact reciprocal (attn is exposed)

    out = lax.dot_general(p.astype(v.dtype), v, (((2,), (1,)), ((0,), (0,))),
                          preferred_element_type=jnp.float32)          # (HB, TQ, D)

    o_ref[0] = out.astype(o_ref.dtype)
    attn_ref[0] = p.astype(attn_ref.dtype)


def _sdpa_flash_kernel(*refs, inv_temperature, has_mask, kv_tile, kv_len):
    """Online-softmax (flash) step: grid = (B, H//HB, Lq//TQ, Lk//TK)."""
    if has_mask:
        q_ref, k_ref, v_ref, mask_ref, o_ref, m_sc, l_sc, acc_sc = refs
    else:
        q_ref, k_ref, v_ref, o_ref, m_sc, l_sc, acc_sc = refs
        mask_ref = None

    kv = pl.program_id(3)

    @pl.when(kv == 0)
    def _():
        m_sc[...] = jnp.full(m_sc.shape, -jnp.inf, dtype=m_sc.dtype)
        l_sc[...] = jnp.zeros(l_sc.shape, dtype=l_sc.dtype)
        acc_sc[...] = jnp.zeros(acc_sc.shape, dtype=acc_sc.dtype)

    q = q_ref[0] * inv_temperature     # (HB, TQ, D)
    k = k_ref[0]                       # (HB, TK, D)
    v = v_ref[0]                       # (HB, TK, D)

    s = lax.dot_general(q, k, (((2,), (2,)), ((0,), (0,))),
                        preferred_element_type=jnp.float32)            # (HB, TQ, TK)
    if has_mask:
        s = jnp.where(mask_ref[0] != 0, s, _NEG_INF)
    if kv_len % kv_tile != 0:
        # Mask padded key columns of the (cdiv-padded) last kv block.
        col = lax.broadcasted_iota(jnp.int32, s.shape, 2) + kv * kv_tile
        s = jnp.where(col < kv_len, s, _NEG_INF)

    m_prev = m_sc[...]                                                  # (HB, TQ, 1)
    m_new = jnp.maximum(m_prev, jnp.max(s, axis=-1, keepdims=True))
    alpha = jnp.exp(m_prev - m_new)
    p = jnp.exp(s - m_new)
    l_sc[...] = alpha * l_sc[...] + jnp.sum(p, axis=-1, keepdims=True)
    acc_sc[...] = alpha * acc_sc[...] + lax.dot_general(
        p.astype(v.dtype), v, (((2,), (1,)), ((0,), (0,))),
        preferred_element_type=jnp.float32)
    m_sc[...] = m_new

    @pl.when(kv == pl.num_programs(3) - 1)
    def _():
        o_ref[0] = (acc_sc[...] * (1.0 / l_sc[...])).astype(o_ref.dtype)


# -----------------------------------------------------------------------------
# Tiling heuristics
# -----------------------------------------------------------------------------

def _vmem_budget():
    """Generation-aware VMEM sizing (v5e/v6e: 128 MiB, v7x: 64 MiB per core)."""
    cap = None
    try:
        info = pltpu.get_tpu_info()
        cap = getattr(info, "vmem_capacity_bytes", None)
    except Exception:
        cap = None
    if not cap or cap <= 0:
        cap = 64 * 1024 * 1024            # conservative default (v7x per-core VMEM)
    budget = int(cap * 0.40)              # tile-search working-set budget
    limit = min(int(cap * 0.75), 96 * 1024 * 1024)
    return budget, limit


def _tq_candidates(Lq):
    cands = []
    if Lq <= 1024:
        cands.append(Lq)                  # no q tiling
    for t in (1024, 512, 256, 128):
        if t < Lq and Lq % t == 0:
            cands.append(t)               # exact divisor tiles (no padded last tile)
    for t in (512, 256, 128, 64, 32, 16, 8):
        if t < Lq:
            cands.append(t)               # padded last tile (benign: writes dropped)
    cands.append(min(Lq, 8))
    out, seen = [], set()
    for t in cands:
        if t not in seen:
            seen.add(t)
            out.append(t)
    return out


def _choose_tk(Lk):
    if Lk <= 512:
        return Lk
    for t in (512, 384, 256, 128):
        if Lk % t == 0:
            return t
    return 512    # padded last block handled by an in-kernel key-validity mask


def _choose_tiles(H, Lq, D, kv_block, itemsize, mask_itemsize, mask_per_head,
                  attn_out, budget):
    """Pick (TQ, HB): the largest q-tile / head-block whose working set fits `budget`."""
    def working_set(tq, hb):
        io = 2 * hb * tq * D * itemsize                # q block + out block
        io += 2 * hb * kv_block * D * itemsize         # k, v blocks
        if mask_itemsize:
            io += (hb if mask_per_head else 1) * tq * kv_block * mask_itemsize
        if attn_out:
            io += hb * tq * kv_block * itemsize        # attention-prob output block
        ws = 2 * io                                    # double-buffered pipelining
        ws += 2 * hb * tq * kv_block * 4               # f32 score / prob temporaries
        ws += hb * tq * (D + 2) * 4                    # f32 acc + m/l rows
        return ws

    hb_divisors = [d for d in range(H, 0, -1) if H % d == 0]
    for tq in _tq_candidates(Lq):
        for hb in hb_divisors:
            if working_set(tq, hb) <= budget:
                return tq, hb
    return min(Lq, 8), 1


def _megacore_guard(B, H, hb, n_q_tiles):
    """Keep >= 2 steps on the parallel grid axes so v7x's 2 TensorCores both get work."""
    if B * (H // hb) * n_q_tiles >= 2 or hb <= 1:
        return hb
    for cand in range(hb - 1, 0, -1):
        if H % cand == 0:
            return cand
    return hb


# -----------------------------------------------------------------------------
# Wrapper
# -----------------------------------------------------------------------------

def scaled_dot_product_attention(q, k, v, mask=None, *, temperature=1.0,
                                 return_attn=True):
    """q: (B, H, Lq, D); k, v: (B, H, Lk, D); mask broadcastable to (B, H, Lq, Lk).

    return_attn=True  -> (output, attn), like the PyTorch module (eval mode).
    return_attn=False -> output only, via the flash (online-softmax) kernel.
    """
    # TODO(synk): attn_dropout (training-mode nn.Dropout) not implemented; eval() semantics.
    B, H, Lq, D = q.shape
    Lk = k.shape[2]
    has_mask = mask is not None
    inv_temperature = float(1.0 / temperature)

    if has_mask:
        mask = jnp.asarray(mask)
        while mask.ndim < 4:
            mask = mask[None]
        if mask.dtype == jnp.bool_:
            mask = mask.astype(jnp.int8)             # small, layout-friendly in VMEM
        Bm = B if mask.shape[0] == B else 1
        Hm = H if mask.shape[1] == H else 1
        # Broadcast only the (Lq, Lk) dims; singleton batch/head dims stay singleton so
        # the mask is neither duplicated in HBM nor re-DMA'd B*H times.
        mask = jnp.broadcast_to(mask, (Bm, Hm, Lq, Lk))
        mask_itemsize = jnp.dtype(mask.dtype).itemsize
        mask_b_full = (Bm == B) and B > 1
        mask_h_full = (Hm == H) and H > 1
    else:
        mask_itemsize = 0
        mask_b_full = mask_h_full = False

    itemsize = jnp.dtype(q.dtype).itemsize
    budget, vmem_limit = _vmem_budget()
    flash = not return_attn
    TK = _choose_tk(Lk) if flash else Lk
    TQ, HB = _choose_tiles(H, Lq, D, TK, itemsize, mask_itemsize,
                           mask_h_full, attn_out=return_attn, budget=budget)
    n_q = pl.cdiv(Lq, TQ)
    HB = _megacore_guard(B, H, HB, n_q)
    n_h = H // HB
    mask_hb = HB if mask_h_full else 1

    flops = 4 * B * H * Lq * Lk * D
    bytes_accessed = (q.size + k.size + v.size + B * H * Lq * D) * itemsize
    if return_attn:
        bytes_accessed += B * H * Lq * Lk * itemsize
    if has_mask:
        bytes_accessed += mask.size * mask_itemsize
    cost = pl.CostEstimate(flops=int(flops),
                           transcendentals=int(B * H * Lq * Lk),
                           bytes_accessed=int(bytes_accessed))

    if flash:
        n_kv = pl.cdiv(Lk, TK)
        grid = (B, n_h, n_q, n_kv)
        kernel = functools.partial(_sdpa_flash_kernel,
                                   inv_temperature=inv_temperature,
                                   has_mask=has_mask, kv_tile=TK, kv_len=Lk)
        in_specs = [
            pl.BlockSpec((1, HB, TQ, D), lambda b, h, qi, kv: (b, h, qi, 0)),
            pl.BlockSpec((1, HB, TK, D), lambda b, h, qi, kv: (b, h, kv, 0)),
            pl.BlockSpec((1, HB, TK, D), lambda b, h, qi, kv: (b, h, kv, 0)),
        ]
        inputs = [q, k, v]
        if has_mask:
            in_specs.append(pl.BlockSpec(
                (1, mask_hb, TQ, TK),
                lambda b, h, qi, kv: (b if mask_b_full else 0,
                                      h if mask_h_full else 0, qi, kv)))
            inputs.append(mask)
        out_shape = jax.ShapeDtypeStruct((B, H, Lq, D), q.dtype)
        out_specs = pl.BlockSpec((1, HB, TQ, D), lambda b, h, qi, kv: (b, h, qi, 0))
        scratch = [pltpu.VMEM((HB, TQ, 1), jnp.float32),   # running max
                   pltpu.VMEM((HB, TQ, 1), jnp.float32),   # running denom
                   pltpu.VMEM((HB, TQ, D), jnp.float32)]   # running accumulator
        dims = ("parallel", "parallel", "parallel", "arbitrary")
    else:
        grid = (B, n_h, n_q)
        kernel = functools.partial(_sdpa_full_kernel,
                                   inv_temperature=inv_temperature,
                                   has_mask=has_mask)
        in_specs = [
            pl.BlockSpec((1, HB, TQ, D), lambda b, h, qi: (b, h, qi, 0)),
            # K/V index_maps ignore the q-tile axis -> resident, not re-DMA'd per q tile.
            pl.BlockSpec((1, HB, Lk, D), lambda b, h, qi: (b, h, 0, 0)),
            pl.BlockSpec((1, HB, Lk, D), lambda b, h, qi: (b, h, 0, 0)),
        ]
        inputs = [q, k, v]
        if has_mask:
            in_specs.append(pl.BlockSpec(
                (1, mask_hb, TQ, Lk),
                lambda b, h, qi: (b if mask_b_full else 0,
                                  h if mask_h_full else 0, qi, 0)))
            inputs.append(mask)
        out_shape = (jax.ShapeDtypeStruct((B, H, Lq, D), q.dtype),
                     jax.ShapeDtypeStruct((B, H, Lq, Lk), q.dtype))
        out_specs = (pl.BlockSpec((1, HB, TQ, D), lambda b, h, qi: (b, h, qi, 0)),
                     pl.BlockSpec((1, HB, TQ, Lk), lambda b, h, qi: (b, h, qi, 0)))
        scratch = []
        dims = ("parallel", "parallel", "parallel")

    return pl.pallas_call(
        kernel,
        out_shape=out_shape,
        grid_spec=pltpu.PrefetchScalarGridSpec(
            num_scalar_prefetch=0,
            grid=grid,
            in_specs=in_specs,
            out_specs=out_specs,
            scratch_shapes=scratch),
        compiler_params=pltpu.CompilerParams(
            dimension_semantics=dims,
            vmem_limit_bytes=vmem_limit),
        cost_estimate=cost,
    )(*inputs)


# -----------------------------------------------------------------------------
# Reference + test
# -----------------------------------------------------------------------------

def _reference(q, k, v, mask, temperature):
    # Faithful to the PyTorch module (eval mode). Use HIGHEST matmul precision so the
    # reference itself is not polluted by the TPU's default (bf16-class) f32 matmul.
    hp = jax.lax.Precision.HIGHEST
    attn = jnp.matmul(q / temperature, jnp.swapaxes(k, 2, 3), precision=hp)
    if mask is not None:
        attn = attn + (1.0 - mask) * _NEG_INF
    attn = jax.nn.softmax(attn, axis=-1)
    out = jnp.matmul(attn, v, precision=hp)
    return out, attn


if __name__ == "__main__":
    key = jax.random.PRNGKey(0)
    B, H, Lq, Lk, D = 2, 4, 8, 8, 32
    temperature = float(D) ** 0.5

    kq, kk, kvv, km = jax.random.split(key, 4)
    q = jax.random.normal(kq, (B, H, Lq, D), dtype=jnp.float32)
    k = jax.random.normal(kk, (B, H, Lk, D), dtype=jnp.float32)
    v = jax.random.normal(kvv, (B, H, Lk, D), dtype=jnp.float32)
    # Binary mask with singleton head dim (broadcast over heads handled in-kernel).
    mask = (jax.random.uniform(km, (B, 1, Lq, Lk)) > 0.3).astype(jnp.float32)

    out_ref, attn_ref = _reference(q, k, v, mask, temperature)
    out_ref_nm, attn_ref_nm = _reference(q, k, v, None, temperature)

    # TPU's default matmul precision for f32 inputs is bf16-class; the tolerance
    # below covers that while the reference is computed at HIGHEST precision.
    tol = dict(atol=2e-2, rtol=2e-2)

    # Masked path: returns (output, attn) like the PyTorch module.
    out, attn = scaled_dot_product_attention(q, k, v, mask, temperature=temperature)
    jax.block_until_ready(out)
    jax.block_until_ready(attn)
    assert out.shape == (B, H, Lq, D) and attn.shape == (B, H, Lq, Lk)
    assert jnp.allclose(out, out_ref, **tol), "output mismatch (masked)"
    assert jnp.allclose(attn, attn_ref, **tol), "attn mismatch (masked)"
    assert jnp.allclose(jnp.sum(attn, axis=-1), 1.0, atol=1e-3), "attn rows must sum to 1"

    # No-mask path (separate kernel variant, no dummy mask DMA).
    out_nm, attn_nm = scaled_dot_product_attention(q, k, v, None, temperature=temperature)
    jax.block_until_ready(out_nm)
    assert jnp.allclose(out_nm, out_ref_nm, **tol), "output mismatch (no mask)"
    assert jnp.allclose(attn_nm, attn_ref_nm, **tol), "attn mismatch (no mask)"

    # Output-only flash path (online softmax, no O(Lq*Lk) attn writeback).
    out_fl = scaled_dot_product_attention(q, k, v, mask, temperature=temperature,
                                          return_attn=False)
    out_fl = jax.block_until_ready(out_fl)
    assert jnp.allclose(out_fl, out_ref, **tol), "output mismatch (flash, masked)"

    out_fl_nm = scaled_dot_product_attention(q, k, v, None, temperature=temperature,
                                             return_attn=False)
    out_fl_nm = jax.block_until_ready(out_fl_nm)
    assert jnp.allclose(out_fl_nm, out_ref_nm, **tol), "output mismatch (flash, no mask)"

    print("KERNEL_OK")
</pallas_src>

<mosaic_0001>
module attributes {stable_mosaic.version = 11 : i64} {
  func.func @_sdpa_full_kernel(%arg0: i32, %arg1: i32, %arg2: i32, %arg3: memref<1x4x8x32xf32, #tpu.memory_space<vmem>>, %arg4: memref<1x4x8x32xf32, #tpu.memory_space<vmem>>, %arg5: memref<1x4x8x32xf32, #tpu.memory_space<vmem>>, %arg6: memref<1x1x8x8xf32, #tpu.memory_space<vmem>>, %arg7: memref<1x4x8x32xf32, #tpu.memory_space<vmem>>, %arg8: memref<1x4x8x8xf32, #tpu.memory_space<vmem>>) attributes {dimension_semantics = [#tpu.dimension_semantics<parallel>, #tpu.dimension_semantics<parallel>, #tpu.dimension_semantics<parallel>], iteration_bounds = array<i64: 2, 1, 1>, scalar_prefetch = 0 : i64, scratch_operands = 0 : i64, tpu.core_type = #tpu.core_type<tc>, window_params = [{transform_indices = @transform_0, window_bounds = array<i64: 1, 4, 8, 32>}, {transform_indices = @transform_1, window_bounds = array<i64: 1, 4, 8, 32>}, {transform_indices = @transform_2, window_bounds = array<i64: 1, 4, 8, 32>}, {transform_indices = @transform_3, window_bounds = array<i64: 1, 1, 8, 8>}, {transform_indices = @transform_4, window_bounds = array<i64: 1, 4, 8, 32>}, {transform_indices = @transform_5, window_bounds = array<i64: 1, 4, 8, 8>}]} {
    %c0 = arith.constant 0 : index
    %c0_0 = arith.constant 0 : index
    %c0_1 = arith.constant 0 : index
    %c0_2 = arith.constant 0 : index
    %0 = vector.load %arg3[%c0, %c0_0, %c0_1, %c0_2] : memref<1x4x8x32xf32, #tpu.memory_space<vmem>>, vector<1x4x8x32xf32>
    %1 = vector.shape_cast %0 : vector<1x4x8x32xf32> to vector<4x8x32xf32>
    %cst = arith.constant 0.176776692 : f32
    %2 = vector.broadcast %cst : f32 to vector<4x8x32xf32>
    %3 = arith.mulf %1, %2 : vector<4x8x32xf32>
    %c0_3 = arith.constant 0 : index
    %c0_4 = arith.constant 0 : index
    %c0_5 = arith.constant 0 : index
    %c0_6 = arith.constant 0 : index
    %4 = vector.load %arg4[%c0_3, %c0_4, %c0_5, %c0_6] : memref<1x4x8x32xf32, #tpu.memory_space<vmem>>, vector<1x4x8x32xf32>
    %5 = vector.shape_cast %4 : vector<1x4x8x32xf32> to vector<4x8x32xf32>
    %c0_7 = arith.constant 0 : index
    %c0_8 = arith.constant 0 : index
    %c0_9 = arith.constant 0 : index
    %c0_10 = arith.constant 0 : index
    %6 = vector.load %arg5[%c0_7, %c0_8, %c0_9, %c0_10] : memref<1x4x8x32xf32, #tpu.memory_space<vmem>>, vector<1x4x8x32xf32>
    %7 = vector.shape_cast %6 : vector<1x4x8x32xf32> to vector<4x8x32xf32>
    %cst_11 = arith.constant dense<0.000000e+00> : vector<4x8x8xf32>
    %8 = tpu.matmul %3, %5, %cst_11 {dimension_numbers = #tpu.dot_dimension_numbers<[2], [2], [1], [1], [0, 0, 0, 1, 1, 1], [0], [0]>} : vector<4x8x32xf32>, vector<4x8x32xf32>, vector<4x8x8xf32> -> vector<4x8x8xf32>
    %c0_12 = arith.constant 0 : index
    %c0_13 = arith.constant 0 : index
    %c0_14 = arith.constant 0 : index
    %c0_15 = arith.constant 0 : index
    %9 = vector.load %arg6[%c0_12, %c0_13, %c0_14, %c0_15] : memref<1x1x8x8xf32, #tpu.memory_space<vmem>>, vector<1x1x8x8xf32>
    %10 = vector.shape_cast %9 : vector<1x1x8x8xf32> to vector<1x8x8xf32>
    %cst_16 = arith.constant 0.000000e+00 : f32
    %11 = vector.broadcast %cst_16 : f32 to vector<1x8x8xf32>
    %12 = arith.cmpf one, %10, %11 : vector<1x8x8xf32>
    %cst_17 = arith.constant -1.000000e+09 : f32
    %13 = vector.shape_cast %12 : vector<1x8x8xi1> to vector<1x8x8xi1>
    %14 = vector.broadcast %13 : vector<1x8x8xi1> to vector<4x8x8xi1>
    %15 = vector.broadcast %cst_17 : f32 to vector<4x8x8xf32>
    %16 = arith.select %14, %8, %15 : vector<4x8x8xi1>, vector<4x8x8xf32>
    %cst_18 = arith.constant dense<0xFF800000> : vector<4x8xf32>
    %17 = vector.multi_reduction <maximumf>, %16, %cst_18 [2] : vector<4x8x8xf32> to vector<4x8xf32>
    %18 = vector.shape_cast %17 : vector<4x8xf32> to vector<4x8x1xf32>
    %19 = vector.broadcast %18 : vector<4x8x1xf32> to vector<4x8x8xf32>
    %20 = arith.subf %16, %19 : vector<4x8x8xf32>
    %21 = math.exp %20 : vector<4x8x8xf32>
    %cst_19 = arith.constant dense<0.000000e+00> : vector<4x8xf32>
    %22 = vector.multi_reduction <add>, %21, %cst_19 [2] : vector<4x8x8xf32> to vector<4x8xf32>
    %23 = vector.shape_cast %22 : vector<4x8xf32> to vector<4x8x1xf32>
    %cst_20 = arith.constant 1.000000e+00 : f32
    %24 = vector.broadcast %cst_20 : f32 to vector<4x8x1xf32>
    %25 = arith.divf %24, %23 : vector<4x8x1xf32>
    %26 = vector.broadcast %25 : vector<4x8x1xf32> to vector<4x8x8xf32>
    %27 = arith.mulf %21, %26 : vector<4x8x8xf32>
    %cst_21 = arith.constant dense<0.000000e+00> : vector<4x8x32xf32>
    %28 = tpu.matmul %27, %7, %cst_21 {dimension_numbers = #tpu.dot_dimension_numbers<[2], [1], [1], [2], [0, 0, 0, 1, 1, 2], [0], [0]>} : vector<4x8x8xf32>, vector<4x8x32xf32>, vector<4x8x32xf32> -> vector<4x8x32xf32>
    %c0_22 = arith.constant 0 : index
    %c0_23 = arith.constant 0 : index
    %c0_24 = arith.constant 0 : index
    %c0_25 = arith.constant 0 : index
    %29 = vector.load %arg7[%c0_22, %c0_23, %c0_24, %c0_25] : memref<1x4x8x32xf32, #tpu.memory_space<vmem>>, vector<1x4x8x32xf32>
    %30 = vector.shape_cast %29 : vector<1x4x8x32xf32> to vector<4x8x32xf32>
    %31 = vector.shape_cast %28 : vector<4x8x32xf32> to vector<1x4x8x32xf32>
    tpu.vector_store %arg7[%c0_22, %c0_23, %c0_24, %c0_25], %31 {strides = array<i32>} : memref<1x4x8x32xf32, #tpu.memory_space<vmem>>, vector<1x4x8x32xf32>,
    %c0_26 = arith.constant 0 : index
    %c0_27 = arith.constant 0 : index
    %c0_28 = arith.constant 0 : index
    %c0_29 = arith.constant 0 : index
    %32 = vector.load %arg8[%c0_26, %c0_27, %c0_28, %c0_29] : memref<1x4x8x8xf32, #tpu.memory_space<vmem>>, vector<1x4x8x8xf32>
    %33 = vector.shape_cast %32 : vector<1x4x8x8xf32> to vector<4x8x8xf32>
    %34 = vector.shape_cast %27 : vector<4x8x8xf32> to vector<1x4x8x8xf32>
    tpu.vector_store %arg8[%c0_26, %c0_27, %c0_28, %c0_29], %34 {strides = array<i32>} : memref<1x4x8x8xf32, #tpu.memory_space<vmem>>, vector<1x4x8x8xf32>,
    return
  }
  func.func @transform_0(%arg0: i32, %arg1: i32, %arg2: i32) -> (i32, i32, i32, i32) {
    %c0_i32 = arith.constant 0 : i32
    %c0_i32_0 = arith.constant 0 : i32
    return %arg0, %arg1, %arg2, %c0_i32 : i32, i32, i32, i32
  }
  func.func @transform_1(%arg0: i32, %arg1: i32, %arg2: i32) -> (i32, i32, i32, i32) {
    %c0_i32 = arith.constant 0 : i32
    %c0_i32_0 = arith.constant 0 : i32
    %c0_i32_1 = arith.constant 0 : i32
    return %arg0, %arg1, %c0_i32, %c0_i32_0 : i32, i32, i32, i32
  }
  func.func @transform_2(%arg0: i32, %arg1: i32, %arg2: i32) -> (i32, i32, i32, i32) {
    %c0_i32 = arith.constant 0 : i32
    %c0_i32_0 = arith.constant 0 : i32
    %c0_i32_1 = arith.constant 0 : i32
    return %arg0, %arg1, %c0_i32, %c0_i32_0 : i32, i32, i32, i32
  }
  func.func @transform_3(%arg0: i32, %arg1: i32, %arg2: i32) -> (i32, i32, i32, i32) {
    %c0_i32 = arith.constant 0 : i32
    %c0_i32_0 = arith.constant 0 : i32
    %c0_i32_1 = arith.constant 0 : i32
    return %arg0, %c0_i32, %arg2, %c0_i32_0 : i32, i32, i32, i32
  }
  func.func @transform_4(%arg0: i32, %arg1: i32, %arg2: i32) -> (i32, i32, i32, i32) {
    %c0_i32 = arith.constant 0 : i32
    %c0_i32_0 = arith.constant 0 : i32
    return %arg0, %arg1, %arg2, %c0_i32 : i32, i32, i32, i32
  }
  func.func @transform_5(%arg0: i32, %arg1: i32, %arg2: i32) -> (i32, i32, i32, i32) {
    %c0_i32 = arith.constant 0 : i32
    %c0_i32_0 = arith.constant 0 : i32
    return %arg0, %arg1, %arg2, %c0_i32 : i32, i32, i32, i32
  }
}

</mosaic_0001>

<bundles_post_ra>
// kernel: tpu_custom_call.1
= control target key start
LH: loop header
LB: loop body
LE: loop exit
PB: predicated region body
PF: predicated region fallthrough
CT: control target
= control target key end

     0   :  { %s2163_s0 = inlined_call_operand.hbm [shape: f32[2,4,8,32], index: 0, kind: input, shape index: {}]   ;;  %s2164_s1 = inlined_call_operand.hbm [shape: f32[2,4,8,32], index: 1, kind: input, shape index: {}]   ;;  %s2165_s2 = inlined_call_operand.hbm [shape: f32[2,4,8,32], index: 2, kind: input, shape index: {}]   ;;  %s2166_s3 = inlined_call_operand.hbm [shape: f32[2,1,8,8], index: 3, kind: input, shape index: {}]   ;;  %s2167_s4 = inlined_call_operand.hbm [shape: f32[2,4,8,32], index: 4, kind: output, shape index: {0}]   ;;  %s2168_s5 = inlined_call_operand.hbm [shape: f32[2,4,8,8], index: 5, kind: output, shape index: {1}]  }
   0x1   :  { %2176 = sst [smem:[#allocation23_spill]] %s2164_s1 }
   0x2   :  { %2177 = sst [smem:[#allocation24_spill]] %s2167_s4 }
   0x3   :  { %11 = vsyncpa [#allocation3], 0 }
   0x4   :  { %13 = vsyncpa [#allocation3 + $0x1], 0 }
   0x5   :  { %14 = vsyncpa [#allocation6], 0 }
   0x6   :  { %16 = vsyncpa [#allocation6 + $0x1], 0 }
   0x7   :  { %17 = vsyncpa [#allocation9], 0 }
   0x8   :  { %19 = vsyncpa [#allocation9 + $0x1], 0 }
   0x9   :  { %20 = vsyncpa [#allocation4], 0 }
   0xa   :  { %22 = vsyncpa [#allocation4 + $0x1], 0 }
   0xb   :  { %23 = vsyncpa [#allocation12], 0 }
   0xc   :  { %25 = vsyncpa [#allocation12 + $0x1], 0  ;;  %s1819_s18 = smov 0   ;;  %s1821_s19 = smov 0  }
   0xd   :  { %s1823_s20 = smov 0   ;;  %s1825_s21 = smov 0  }
   0xe   :  { %s1827_s22 = smov 0   ;;  %s1829_s23 = smov 0  }
   0xf LB: > { %2178 = sst [smem:[#allocation18_spill]] %s1755_s18  ;;  %s1850_s24 = sadd.s32 4294967295, %s1775_s23   ;;  %s1775_s23 = sphi %s1829_s23, %s31_s23   ;;  %s1771_s22 = sphi %s1827_s22, %s2201_s22   ;;  %s1767_s21 = sphi %s1825_s21, %s2200_s21   ;;  %s1763_s20 = sphi %s1823_s20, %s2196_s20   ;;  %s1759_s19 = sphi %s1821_s19, %s2199_s19   ;;  %s1755_s18 = sphi %s1819_s18, %s2198_s18  }
  0x10   : > { %2179 = sst [smem:[#allocation19_spill]] %s1763_s20  ;;  %s1339_s25 = sadd.s32 4294967294, %s1775_s23  }
  0x11   : > { %s50_s26 = sadd.s32 1, %s1771_s22  ;;  %s61_s27 = sadd.s32 1, %s1763_s20 }
  0x12   : > { %p52_p0 = scmp.ge.s32.totalorder %s50_s26, 2  ;;  %p68_p1 = scmp.ne.s32.totalorder %s1763_s20, %s1759_s19 }
  0x13   : > { %p69_p2 = scmp.eq.s32.totalorder %s1775_s23, 0  ;;  %p74_p3 = scmp.ne.s32.totalorder %s1759_s19, %s1755_s18 }
  0x14   : > { %s2203_s26 = smov (%p52_p0, %s50_s26), 0  ;;  %p75_p5 = scmp.eq.s32.totalorder %s1850_s24, 0 }
  0x15   : > { %2180 = sst [smem:[#allocation20_spill]] %s2203_s26  ;;  %p1862_p4 = por %p69_p2, %p68_p1 }
  0x16   : > { %s54_s29 = ssub.s32 %s1771_s22, %s2203_s26  ;;  %p186_p6 = scmp.eq.s32.totalorder %s1850_s24, 1 }
  0x17   : > { %p59_p7 = scmp.eq.s32.totalorder %s54_s29, 0  ;;  %p1870_p8 = por %p75_p5, %p74_p3 }
  0x18   : > { %p1874_p9 = por %p186_p6, %p68_p1  ;;  %p192_p10 = scmp.eq.s32.totalorder %s1339_s25, 1 }
  0x19   : > { %s1879_s7 = scalar_select %p59_p7, %s1763_s20, %s61_s27  }
  0x1a   : > { %p1881_p11 = por %p192_p10, %p74_p3  ;;  %p1473_p13 = scmp.lt.s32.totalorder %s1775_s23, 2 }
  0x1b   : > { %2184 = sst [smem:[#allocation21_spill]] %s1879_s7  ;;  %s1888_s9 = sand.u32 1, %s1763_s20  }
  0x1c   : > { %s2185_s8 = scalar_select %p1881_p11, 1, 0 }
  0x1d   : > { %s1891_s10 = sshll.u32 %s1888_s9, 5  ;;  %s1894_s11 = sshll.u32 %s1771_s22, 9 }
  0x1e   : > { %2186 = sst [smem:[#allocation22_spill]] %s2185_s8  ;;  %p1898_p0 = pnand %p1473_p13, %p1862_p4 }
  0x1f   : > { %s266_s13 = sand.u32 1, %s1775_s23   ;;  %s2188_s1 = sld [smem:[#allocation23_spill]] }
  0x20   : > { %s270_s17 = scalar_lea.vmem [#allocation5], %s1891_s10  ;;  %p1353_p1 = scmp.ge.s32.totalorder %s1775_s23, 1 }
  0x21   : > { %s279_s25 = sshll.u32 %s270_s17, 4  ;;  %p329_p2 = scmp.lt.s32.totalorder %s1775_s23, 3  ;;  %s280_s25 = int_to_ptr.vmem [resolvable:$true] %s279_s25 }
  0x22   : > { %s1910_s27 = scalar_lea.sflag [#allocation6], %s266_s13  ;;  %p1547_p3 = pneg %p1898_p0 }
  0x23   : > { %s1558_s28 = scalar_lea.vmem %s280_s25, 512  ;;  %s1777_s29 = smov [#allocation5]  }
  0x24   : > { %p1559_p4 = scmp.ne.s32.totalorder %s280_s25, %s1558_s28  ;;  %s1563_s26 = sshll.u32 %s1777_s29, 4  ;;  %s1564_s26 = int_to_ptr.vmem [resolvable:$false] %s1563_s26 }
  0x25   : > { %s278_s16 = scalar_lea.hbm %s2188_s1, %s1894_s11  ;;  %s1565_s14 = scalar_lea.vmem %s1564_s26, 1024 }
  0x26   : > { %p1561_p5 = pnand %p1559_p4, %p1547_p3  ;;  %p1566_p7 = scmp.lt.s32.totalorder %s280_s25, %s1564_s26 }
  0x27   : > { %p1567_p10 = scmp.lt.s32.totalorder %s1565_s14, %s1558_s28 }
  0x28   : > { %p1562_p6 = pneg %p1561_p5 }
  0x29   : > { %p1568_p13 = por %p1567_p10, %p1566_p7 }
  0x2b   : > { %p1569_p12 = pnand %p1568_p13, %p1562_p6 }
  0x2d   : > { %1572 = shalt.err (!%p1569_p12)
}
  0x2e   : > { %s2174_s15 = smov 128   ;;  %s1779_s13 = smov 8  }
  0x2f   : > { %1459 = dma.hbm_to_vmem [thread:$0]  (!%p1898_p0), %s278_s16, 512, %s280_s25, %s1910_s27, %s2174_s15, %s2174_s15, %s1779_s13  }
  0x30   : > { %p1927_p4 = pnand %p1353_p1, %p329_p2  ;;  %s255_s29 = scalar_lea.hbm %s2163_s0, %s1894_s11 }
  0x31   : > { %s246_s14 = scalar_lea.vmem [#allocation2], %s1891_s10  ;;  %s301_s8 = scalar_lea.hbm %s2165_s2, %s1894_s11 }
  0x32   : > { %s256_s1 = sshll.u32 %s246_s14, 4  ;;  %s243_s18 = scalar_lea.sflag [#allocation3], %s1888_s9  ;;  %s257_s1 = int_to_ptr.vmem [resolvable:$true] %s256_s1 }
  0x33   : > { %s1586_s4 = scalar_lea.vmem %s257_s1, 512  ;;  %s1780_s16 = smov [#allocation2]  }
  0x34   : > { %p1587_p12 = scmp.ne.s32.totalorder %s257_s1, %s1586_s4  ;;  %s1591_s25 = sshll.u32 %s1780_s16, 4  ;;  %s1592_s25 = int_to_ptr.vmem [resolvable:$false] %s1591_s25 }
  0x35   : > { %s1593_s15 = scalar_lea.vmem %s1592_s25, 1024  ;;  %p1594_p5 = scmp.lt.s32.totalorder %s257_s1, %s1592_s25 }
  0x36   : > { %p1589_p1 = pnand %p1587_p12, %p1547_p3  ;;  %p1595_p6 = scmp.lt.s32.totalorder %s1593_s15, %s1586_s4 }
  0x38   : > { %p1590_p2 = pneg %p1589_p1  ;;  %p1596_p7 = por %p1595_p6, %p1594_p5 }
  0x3a   : > { %p1597_p10 = pnand %p1596_p7, %p1590_p2 }
  0x3c   : > { %1600 = shalt.err (!%p1597_p10)
}
  0x3d   : > { %s2190_s20 = smov 128   ;;  %s293_s7 = scalar_lea.vmem [#allocation7], %s1891_s10 }
  0x3e   : > { %1456 = dma.hbm_to_vmem [thread:$0]  (!%p1898_p0), %s255_s29, 512, %s257_s1, %s243_s18, %s2190_s20, %s2190_s20, %s1779_s13  }
  0x3f   : > { %s302_s17 = sshll.u32 %s293_s7, 4  ;;  %s1351_s28 = sshll.u32 %s1888_s9, 3  ;;  %s303_s17 = int_to_ptr.vmem [resolvable:$true] %s302_s17 }
  0x40   : > { %s1614_s14 = scalar_lea.vmem %s303_s17, 512  ;;  %s1781_s4 = smov [#allocation7]  }
  0x41   : > { %p1615_p13 = scmp.ne.s32.totalorder %s303_s17, %s1614_s14  ;;  %s1619_s15 = sshll.u32 %s1781_s4, 4  ;;  %s1620_s15 = int_to_ptr.vmem [resolvable:$false] %s1619_s15 }
  0x42   : > { %s1621_s16 = scalar_lea.vmem %s1620_s15, 1024  ;;  %p1622_p2 = scmp.lt.s32.totalorder %s303_s17, %s1620_s15 }
  0x43   : > { %p1617_p12 = pnand %p1615_p13, %p1547_p3  ;;  %p1623_p5 = scmp.lt.s32.totalorder %s1621_s16, %s1614_s14 }
  0x45   : > { %p1618_p1 = pneg %p1617_p12  ;;  %p1624_p6 = por %p1623_p5, %p1622_p2 }
  0x47   : > { %p1625_p7 = pnand %p1624_p6, %p1618_p1 }
  0x49   : > { %1628 = shalt.err (!%p1625_p7)
}
  0x4a   : > { %1462 = dma.hbm_to_vmem [thread:$0]  (!%p1898_p0), %s301_s8, 512, %s303_s17, %s1910_s27, %s2190_s20, %s2190_s20, %s1779_s13  }
  0x4b   : > { %s1352_s10 = sshll.u32 %s1771_s22, 7  ;;  %s316_s14 = scalar_lea.vmem [#allocation8], %s1351_s28 }
  0x4c   : > { %s322_s7 = scalar_lea.hbm %s2166_s3, %s1352_s10  ;;  %s324_s4 = sshll.u32 %s316_s14, 4  ;;  %s325_s4 = int_to_ptr.vmem [resolvable:$true] %s324_s4 }
  0x4d   : > { %s313_s15 = scalar_lea.sflag [#allocation9], %s1888_s9  ;;  %s1642_s16 = scalar_lea.vmem %s325_s4, 128 }
  0x4e   : > { %p1643_p10 = scmp.ne.s32.totalorder %s325_s4, %s1642_s16  ;;  %s1782_s11 = smov [#allocation8]  }
  0x4f   : > { %s1647_s1 = sshll.u32 %s1782_s11, 4  ;;  %s1648_s1 = int_to_ptr.vmem [resolvable:$false] %s1647_s1 }
  0x50   : > { %p1645_p13 = pnand %p1643_p10, %p1547_p3  ;;  %s1649_s18 = scalar_lea.vmem %s1648_s1, 256 }
  0x51   : > { %p1650_p1 = scmp.lt.s32.totalorder %s325_s4, %s1648_s1  ;;  %p1651_p2 = scmp.lt.s32.totalorder %s1649_s18, %s1642_s16 }
  0x52   : > { %p1646_p12 = pneg %p1645_p13 }
  0x53   : > { %p1652_p5 = por %p1651_p2, %p1650_p1 }
  0x55   : > { %p1653_p6 = pnand %p1652_p5, %p1646_p12 }
  0x57   : > { %1656 = shalt.err (!%p1653_p6)
}
  0x58   : > { %1465 = dma.hbm_to_vmem [thread:$0]  (!%p1898_p0), %s322_s7, 128, %s325_s4, %s313_s15  }
  0x59   : > { %333 = sbr.rel (%p1927_p4) target bundleno = 828 (0x33c), region = 36  ;;  %s1978_s8 = sand.u32 (!%p1927_p4), 1, %s1759_s19  }
  0x5a   : > { %s1981_s9 = sshll.u32 (!%p1927_p4), %s1978_s8, 5  ;;  %s336_s27 = scalar_lea.sflag (!%p1927_p4), [#allocation3], %s1978_s8 }
  0x5b   : > { %s1985_s13 = scalar_lea.vmem (!%p1927_p4), [#allocation2], %s1981_s9 }
  0x5e   : > { %1734 = dma.done.wait (%p1870_p8), %s336_s27, 512  }
  0x5f   : > { %1736 = vsyncadd (%p1870_p8), %s336_s27, 4294966784  ;;  %s344_s12 = sand.u32 1, %s1850_s24   ;;  %s348_s20 = scalar_lea.vmem [#allocation5], %s1981_s9 }
  0x60   : > { %s345_s26 = scalar_lea.sflag [#allocation6], %s344_s12 }
  0x61   : > { %1738 = dma.done.wait (%p1870_p8), %s345_s26, 1024  }
  0x62   : > { %1740 = vsyncadd (%p1870_p8), %s345_s26, 4294966272  ;;  %s1357_s17 = sshll.u32 %s1978_s8, 3  ;;  %s1999_s28 = scalar_lea.vmem [#allocation7], %s1981_s9 }
  0x63   : > { %s363_s10 = scalar_lea.sflag [#allocation9], %s1978_s8  ;;  %s2002_s29 = scalar_lea.vmem [#allocation8], %s1357_s17 }
  0x64   : > { %1742 = dma.done.wait (%p1870_p8), %s363_s10, 128  }
  0x65   : > { %1744 = vsyncadd (%p1870_p8), %s363_s10, 4294967168  ;;  %v1783_v0 = vmov 0.0   ;;  %vm1784_vm0 = vmmov 0   ;;  %vm434_vm1 = vcmask 261120   ;;  %v426_v1 = vld [vmem:[%s348_s20] sm:$0xff]  ;;  %v427_v3 = vld [vmem:[%s348_s20 + $0x8] sm:$0xff] }
  0x66   : > { %1401 = vmatprep.subr.mxu0 %v1783_v0  ;;  %1403 = vmatprep.mubr.msk.f32.mxu0 %vm1784_vm0, %v1783_v0  ;;  %v418_v2 = vld [vmem:[%s1985_s13] sm:$0xff]  ;;  %v419_v5 = vld [vmem:[%s1985_s13 + $0x8] sm:$0xff]  ;;  %v420_v6 = vld [vmem:[%s1985_s13 + $0x10] sm:$0xff]  ;;  %vm747_vm3 = vcmask 64512   ;;  %s412_s24 = scalar_lea.vmem [#allocation11], %s1981_s9  ;;  %s1383_s30 = sshll.u32 %s1767_s21, 9 }
  0x67   : > { %1406 = vmatprep.subr.mxu1 %v1783_v0  ;;  %1408 = vmatprep.mubr.msk.f32.mxu1 %vm1784_vm0, %v1783_v0  ;;  %v422_v4 = vmul.f32 0.17677669, %v418_v2  ;;  %v428_v7 = vld [vmem:[%s348_s20 + $0x10] sm:$0xff]  ;;  %v423_v8 = vmul.f32 0.17677669, %v419_v5  ;;  %v421_v9 = vld [vmem:[%s1985_s13 + $0x18] sm:$0xff]  ;;  %s2072_s4 = scalar_lea.hbm %s2168_s5, %s1383_s30 }
  0x68   : > { %1402 = vmatpush3.xpose.msk.msra.mxu0 %vm434_vm1, %v426_v1  ;;  %1407 = vmatpush3.xpose.msk.msra.mxu1 %vm434_vm1, %v427_v3  ;;  %v429_v10 = vld [vmem:[%s348_s20 + $0x18] sm:$0xff]  ;;  %v424_v11 = vmul.f32 0.17677669, %v420_v6  ;;  %v425_v12 = vmul.f32 0.17677669, %v421_v9  ;;  %v739_v13 = vld [vmem:[%s2002_s29] sm:$0xff] }
  0x69   : > { %1411 = vmatprep.subr.mxu0 %v1783_v0  ;;  %1416 = vmatprep.subr.mxu1 %v1783_v0  ;;  %vm740_vm2 = vcmp.ne.f32.partialorder %v739_v13, 0.0  ;;  %v430_v50 = vld [vmem:[%s1999_s28] sm:$0xff]  ;;  %v431_v51 = vld [vmem:[%s1999_s28 + $0x8] sm:$0xff]  ;;  %v432_v58 = vld [vmem:[%s1999_s28 + $0x10] sm:$0xff]  ;;  %s1137_s25 = sshll.u32 %s412_s24, 4  ;;  %s1102_s15 = scalar_lea.sflag [#allocation12], %s1978_s8  ;;  %s2074_s25 = int_to_ptr.vmem [resolvable:$true] %s1137_s25 }
  0x6a   : > { %v433_v62 = vld [vmem:[%s1999_s28 + $0x18] sm:$0xff]  ;;  %s1657_s16 = scalar_lea.vmem %s2074_s25, 512  ;;  %s1785_s11 = smov [#allocation11]  }
  0x6b   : > { %1404 = vmatmul.mubr.msk.f32.vlgmr.msra.gmra.mxu0 %vm434_vm1, %v422_v4  ;;  %1409 = vmatmul.mubr.msk.f32.vlgmr.msra.gmra.mxu1 %vm434_vm1, %v423_v8  ;;  %p1658_p8 = scmp.ne.s32.totalorder %s2074_s25, %s1657_s16  ;;  %s1661_s1 = sshll.u32 %s1785_s11, 4  ;;  %s1662_s1 = int_to_ptr.vmem [resolvable:$false] %s1661_s1 }
  0x6c   : > { %1412 = vmatpush3.xpose.msk.msra.mxu0 %vm434_vm1, %v428_v7  ;;  %1413 = vmatprep.mubr.msk.f32.mxu0 %vm1784_vm0, %v1783_v0  ;;  %s1663_s18 = scalar_lea.vmem %s1662_s1, 1024  ;;  %p1664_p4 = scmp.lt.s32.totalorder %s2074_s25, %s1662_s1 }
  0x6d   : > { %1417 = vmatpush3.xpose.msk.msra.mxu1 %vm434_vm1, %v429_v10  ;;  %1418 = vmatprep.mubr.msk.f32.mxu1 %vm1784_vm0, %v1783_v0  ;;  %p1659_p0 = pnand %p1658_p8, %p1874_p9  ;;  %p1665_p7 = scmp.lt.s32.totalorder %s1663_s18, %s1657_s16 }
  0x6e   : > { %1421 = vmatprep.subr.mxu0 %v1783_v0  ;;  %1426 = vmatprep.subr.mxu1 %v1783_v0 }
  0x6f   : > { %1414 = vmatmul.mubr.msk.f32.vlgmr.msra.gmra.mxu0 %vm434_vm1, %v424_v11  ;;  %p1660_p3 = pneg %p1659_p0  ;;  %p1666_p10 = por %p1665_p7, %p1664_p4 }
  0x70   : > { %1419 = vmatmul.mubr.msk.f32.vlgmr.msra.gmra.mxu1 %vm434_vm1, %v425_v12  ;;  %1423 = vmatprep.mubr.msk.f32.mxu0 %vm1784_vm0, %v1783_v0 }
  0x71   : > { %1428 = vmatprep.mubr.msk.f32.mxu1 %vm1784_vm0, %v1783_v0  ;;  %1422 = vmatpush3.msra.mxu0 %v430_v50  ;;  %p1667_p13 = pnand %p1666_p10, %p1660_p3 }
  0x72   : > { %1431 = vmatprep.subr.mxu0 %v1783_v0  ;;  %1427 = vmatpush3.msra.mxu1 %v431_v51 }
  0x73   : > { %1436 = vmatprep.subr.mxu1 %v1783_v0 }
 0x12b   : > { %v507_v14 = vpop.f32.mrf.mxu0  ;;  %v583_v15 = vpop.f32.mrf.mxu1 }
 0x12c   : > { %v743_v16 = vsel %vm740_vm2, %v507_v14, -1e+09  ;;  %v744_v17 = vsel %vm740_vm2, %v583_v15, -1e+09 }
 0x12d   : > { %v1405_v18 = vpop.f32.mrf.mxu0  ;;  %v748_v19 = vsel %vm747_vm3, %v743_v16, -inf  ;;  %v1410_v20 = vpop.f32.mrf.mxu1  ;;  %v751_v22 = vsel %vm747_vm3, %v744_v17, -inf }
 0x12e   : > { %749 = vmax.xlane.f32.xlu0 %v748_v19 }
 0x12f   : > { %v659_v21 = vpop.f32.mrf.mxu0 }
 0x130   : > { %v745_v23 = vsel %vm740_vm2, %v659_v21, -1e+09  ;;  %v735_v24 = vpop.f32.mrf.mxu1 }
 0x131   : > { %v1415_v25 = vpop.f32.mrf.mxu0  ;;  %v746_v26 = vsel %vm740_vm2, %v735_v24, -1e+09  ;;  %v754_v27 = vsel %vm747_vm3, %v745_v23, -inf }
 0x132   : > { %752 = vmax.xlane.f32.xlu0 %v751_v22  ;;  %755 = vmax.xlane.f32.xlu1 %v754_v27  ;;  %v1420_v28 = vpop.f32.mrf.mxu1  ;;  %v757_v29 = vsel %vm747_vm3, %v746_v26, -inf }
 0x136   : > { %758 = vmax.xlane.f32.xlu1 %v757_v29 }
 0x1b7   : > { %v750_v30 = vpop.xlane.xlu0 %749 }
 0x1b8   : > { %v760_v31 = vsub.f32 %v743_v16, %v750_v30 }
 0x1ba   : > { %v764_v32 = vmul.f32 1.442695, %v760_v31 }
 0x1bb   : > { %v753_v33 = vpop.xlane.xlu0 %752  ;;  %v756_v34 = vpop.xlane.xlu1 %755 }
 0x1bc   : > { %1529 = vpow2.f32 %v764_v32  ;;  %v761_v35 = vsub.f32 %v744_v17, %v753_v33  ;;  %v762_v36 = vsub.f32 %v745_v23, %v756_v34 }
 0x1be   : > { %v766_v37 = vmul.f32 1.442695, %v761_v35  ;;  %v768_v38 = vmul.f32 1.442695, %v762_v36 }
 0x1bf   : > { %v759_v39 = vpop.xlane.xlu1 %758 }
 0x1c0   : > { %1531 = vpow2.f32 %v766_v37  ;;  %v763_v40 = vsub.f32 %v746_v26, %v759_v39 }
 0x1c1   : > { %1533 = vpow2.f32 %v768_v38 }
 0x1c2   : > { %v770_v41 = vmul.f32 1.442695, %v763_v40 }
 0x1c4   : > { %1535 = vpow2.f32 %v770_v41 }
 0x1c9   : > { %v1530_v42 = vpop.eup %1529 }
 0x1ca   : > { %v772_v43 = vsel %vm747_vm3, %v1530_v42, 0.0 }
 0x1cb   : > { %773 = vadd.xlane.f32.xlu0 %v772_v43 }
 0x1cd   : > { %v1532_v44 = vpop.eup %1531 }
 0x1ce   : > { %v1534_v45 = vpop.eup %1533  ;;  %v775_v46 = vsel %vm747_vm3, %v1532_v44, 0.0 }
 0x1cf   : > { %776 = vadd.xlane.f32.xlu1 %v775_v46  ;;  %v778_v47 = vsel %vm747_vm3, %v1534_v45, 0.0 }
 0x1d0   : > { %779 = vadd.xlane.f32.xlu0 %v778_v47 }
 0x1d1   : > { %v1536_v48 = vpop.eup %1535 }
 0x1d2   : > { %v781_v49 = vsel %vm747_vm3, %v1536_v48, 0.0 }
 0x1d3   : > { %782 = vadd.xlane.f32.xlu1 %v781_v49 }
 0x254   : > { %v774_v52 = vpop.xlane.xlu0 %773 }
 0x255   : > { %1537 = vrcp.f32 %v774_v52 }
 0x258   : > { %v777_v53 = vpop.xlane.xlu1 %776 }
 0x259   : > { %v780_v54 = vpop.xlane.xlu0 %779  ;;  %1539 = vrcp.f32 %v777_v53 }
 0x25a   : > { %1541 = vrcp.f32 %v780_v54 }
 0x25c   : > { %v783_v55 = vpop.xlane.xlu1 %782 }
 0x25d   : > { %1543 = vrcp.f32 %v783_v55 }
 0x262   : > { %v1538_v56 = vpop.eup %1537 }
 0x263   : > { %v792_v57 = vmul.f32 %v1538_v56, %v1530_v42 }
 0x265   : > { %1424 = vmatmul.mubr.msk.f32.vlgmr.msra.gmra.mxu0 %vm747_vm3, %v792_v57  ;;  %1092 = vst.msk [vmem:[%s412_s24] sm:$0xff] %vm747_vm3, %v792_v57 }
 0x266   : > { %v1540_v59 = vpop.eup %1539  ;;  %1432 = vmatpush3.msra.mxu0 %v432_v58  ;;  %1433 = vmatprep.mubr.msk.f32.mxu0 %vm1784_vm0, %v1783_v0 }
 0x267   : > { %v1542_v60 = vpop.eup %1541  ;;  %v793_v61 = vmul.f32 %v1540_v59, %v1532_v44 }
 0x268   : > { %v794_v63 = vmul.f32 %v1542_v60, %v1534_v45 }
 0x269   : > { %1429 = vmatmul.mubr.msk.f32.vlgmr.msra.gmra.mxu1 %vm747_vm3, %v793_v61  ;;  %1093 = vst.msk [vmem:[%s412_s24 + $0x8] sm:$0xff] %vm747_vm3, %v793_v61 }
 0x26a   : > { %v1544_v1 = vpop.eup %1543  ;;  %1434 = vmatmul.mubr.msk.f32.vlgmr.msra.gmra.mxu0 %vm747_vm3, %v794_v63  ;;  %1094 = vst.msk [vmem:[%s412_s24 + $0x10] sm:$0xff] %vm747_vm3, %v794_v63  ;;  %1437 = vmatpush3.msra.mxu1 %v433_v62 }
 0x26b   : > { %1438 = vmatprep.mubr.msk.f32.mxu1 %vm1784_vm0, %v1783_v0  ;;  %v795_v2 = vmul.f32 %v1544_v1, %v1536_v48 }
 0x26d   : > { %1439 = vmatmul.mubr.msk.f32.vlgmr.msra.gmra.mxu1 %vm747_vm3, %v795_v2  ;;  %1095 = vst.msk [vmem:[%s412_s24 + $0x18] sm:$0xff] %vm747_vm3, %v795_v2 }
 0x26e   : > { %1670 = shalt.err (!%p1667_p13)
}
 0x26f   : > { %s1671_s27 = scalar_lea.hbm %s2072_s4, 512  ;;  %s1675_s26 = scalar_lea.hbm %s2168_s5, 1024 }
 0x270   : > { %p1672_p12 = scmp.ne.s32.totalorder %s2072_s4, %s1671_s27  ;;  %p1676_p5 = scmp.lt.s32.totalorder %s2072_s4, %s2168_s5 }
 0x271   : > { %p1677_p6 = scmp.lt.s32.totalorder %s1675_s26, %s1671_s27 }
 0x272   : > { %p1673_p1 = pnand %p1672_p12, %p1874_p9 }
 0x273   : > { %p1678_p8 = por %p1677_p6, %p1676_p5 }
 0x274   : > { %p1674_p2 = pneg %p1673_p1 }
 0x276   : > { %p1679_p0 = pnand %p1678_p8, %p1674_p2 }
 0x278   : > { %1682 = shalt.err (!%p1679_p0)
}
 0x279   : > { %s1786_s28 = smov 128   ;;  %s1787_s10 = smov 8  }
 0x27a   : > { %1450 = dma.vmem_to_hbm [thread:$0]  (%p1874_p9), %s2074_s25, 512, %s2072_s4, %s1102_s15, %s1786_s28, %s1786_s28, %s1787_s10  }
 0x27b   : > { %s405_s29 = scalar_lea.vmem [#allocation10], %s1981_s9  ;;  %s2191_s7 = sld [smem:[#allocation24_spill]] }
 0x27c   : > { %s1118_s24 = sshll.u32 %s405_s29, 4  ;;  %s1097_s4 = scalar_lea.sflag [#allocation4], %s1978_s8  ;;  %s2105_s24 = int_to_ptr.vmem [resolvable:$true] %s1118_s24 }
 0x27d   : > { %s1683_s15 = scalar_lea.vmem %s2105_s24, 512  ;;  %s1788_s16 = smov [#allocation10]  }
 0x27e   : > { %p1684_p3 = scmp.ne.s32.totalorder %s2105_s24, %s1683_s15  ;;  %s1687_s11 = sshll.u32 %s1788_s16, 4  ;;  %s1688_s11 = int_to_ptr.vmem [resolvable:$false] %s1687_s11 }
 0x27f   : > { %s1689_s1 = scalar_lea.vmem %s1688_s11, 1024  ;;  %p1690_p10 = scmp.lt.s32.totalorder %s2105_s24, %s1688_s11 }
 0x280   : > { %p1685_p4 = pnand %p1684_p3, %p1874_p9  ;;  %p1691_p13 = scmp.lt.s32.totalorder %s1689_s1, %s1683_s15 }
 0x281   : > { %s2113_s14 = scalar_lea.hbm %s2191_s7, %s1383_s30 }
 0x282   : > { %p1686_p7 = pneg %p1685_p4  ;;  %p1692_p12 = por %p1691_p13, %p1690_p10 }
 0x284   : > { %p1693_p1 = pnand %p1692_p12, %p1686_p7 }
 0x325   : > { %v865_v0 = vpop.f32.mrf.mxu0 }
 0x326   : > { %1088 = vst.msk [vmem:[%s405_s29] sm:$0xff] %vm434_vm1, %v865_v0 }
 0x327   : > { %v1425_v3 = vpop.f32.mrf.mxu0 }
 0x329   : > { %v938_v4 = vpop.f32.mrf.mxu1 }
 0x32a   : > { %1089 = vst.msk [vmem:[%s405_s29 + $0x8] sm:$0xff] %vm434_vm1, %v938_v4  ;;  %v1011_v5 = vpop.f32.mrf.mxu0 }
 0x32b   : > { %1090 = vst.msk [vmem:[%s405_s29 + $0x10] sm:$0xff] %vm434_vm1, %v1011_v5  ;;  %v1430_v6 = vpop.f32.mrf.mxu1 }
 0x32c   : > { %v1435_v7 = vpop.f32.mrf.mxu0 }
 0x32d   : > { %v1084_v8 = vpop.f32.mrf.mxu1 }
 0x32e   : > { %1091 = vst.msk [vmem:[%s405_s29 + $0x18] sm:$0xff] %vm434_vm1, %v1084_v8 }
 0x32f   : > { %v1440_v9 = vpop.f32.mrf.mxu1 }
 0x330   : > { %1696 = shalt.err (!%p1693_p1)
}
 0x331   : > { %s1697_s21 = scalar_lea.hbm %s2113_s14, 512  ;;  %s1701_s18 = scalar_lea.hbm %s2191_s7, 1024 }
 0x332   : > { %p1698_p2 = scmp.ne.s32.totalorder %s2113_s14, %s1697_s21  ;;  %p1702_p8 = scmp.lt.s32.totalorder %s2113_s14, %s2191_s7 }
 0x333   : > { %p1703_p0 = scmp.lt.s32.totalorder %s1701_s18, %s1697_s21 }
 0x334   : > { %p1699_p5 = pnand %p1698_p2, %p1874_p9 }
 0x335   : > { %p1704_p3 = por %p1703_p0, %p1702_p8 }
 0x336   : > { %p1700_p6 = pneg %p1699_p5 }
 0x338   : > { %p1705_p4 = pnand %p1704_p3, %p1700_p6 }
 0x33a   : > { %1708 = shalt.err (!%p1705_p4)
}
 0x33b   : > { %1449 = dma.vmem_to_hbm [thread:$0]  (%p1874_p9), %s2105_s24, 512, %s2113_s14, %s1097_s4, %s1786_s28, %s1786_s28, %s1787_s10  }
 0x33c PF: > { %s2192_s12 = sld [smem:[#allocation18_spill]]  ;;  %p2194_p7 = scmp.ge.s32.totalorder %s1775_s23, 2 }
 0x33e   : > { %p1467_p10 = pnand %p2194_p7, %p1881_p11 }
 0x340   : > { %p1468_p13 = pneg %p1467_p10 }
 0x342   : > { %s1152_s20 = sand.u32 1, %s2192_s12  }
 0x343   : > { %s1153_s17 = scalar_lea.sflag [#allocation4], %s1152_s20 }
 0x344   : > { %1746 = dma.done.wait (%p1468_p13), %s1153_s17, 512  }
 0x345   : > { %1748 = vsyncadd (%p1468_p13), %s1153_s17, 4294966784  ;;  %s1162_s29 = scalar_lea.sflag [#allocation12], %s1152_s20 }
 0x346   : > { %1750 = dma.done.wait (%p1468_p13), %s1162_s29, 512  }
 0x347   : > { %1752 = vsyncadd (%p1468_p13), %s1162_s29, 4294966784  ;;  %s31_s23 = sadd.s32 1, %s1775_s23   ;;  %s2195_s6 = sld [smem:[#allocation19_spill]] }
 0x348   : > { %p28_p12 = scmp.ge.s32.totalorder %s31_s23, 4   ;;  %s2196_s20 = sld [smem:[#allocation21_spill]] }
 0x349   : > { %s2197_s28 = sld [smem:[#allocation20_spill]]  ;;  %s2198_s18 = smov %s1759_s19 }
 0x34a   : > { %s2200_s21 = smov %s1771_s22 }
 0x34b   :  { %30 = sbr.rel (!%p28_p12) target bundleno = 15 (0xf), region = 135 }
 0x34d   : > { %s2199_s19 = smov %s2195_s6 }
 0x34f   : > { %s2201_s22 = smov %s2197_s28 }
 0x350   :  { %1167 = vsyncpa [#allocation3], 1 }
 0x351   :  { %1169 = vsyncpa [#allocation3 + $0x1], 1 }
 0x352   :  { %1170 = vsyncpa [#allocation6], 1 }
 0x353   :  { %1172 = vsyncpa [#allocation6 + $0x1], 1 }
 0x354   :  { %1173 = vsyncpa [#allocation9], 1 }
 0x355   :  { %1175 = vsyncpa [#allocation9 + $0x1], 1 }
 0x356   :  { %1176 = vsyncpa [#allocation4], 1 }
 0x357   :  { %1178 = vsyncpa [#allocation4 + $0x1], 1 }
 0x358   :  { %1179 = vsyncpa [#allocation12], 1 }
 0x359   :  { %1181 = vsyncpa [#allocation12 + $0x1], 1 }

</bundles_post_ra>
